<compile_context>
chip_gen: v7x
topology: tpu7x:2x2x1
jax: 0.10.0
libtpu: 0.0.40
codegen_flags: <defaults>
</compile_context>

<pallas_src>
import functools

import jax
import jax.numpy as jnp
from jax import lax
from jax.experimental import pallas as pl
from jax.experimental.pallas import tpu as pltpu

EPS = 1e-5
LANE = 128


def _round_up(x, m):
    return ((x + m - 1) // m) * m


def _pad_axis(x, axis, target):
    pad = target - x.shape[axis]
    if pad == 0:
        return x
    cfg = [(0, 0)] * x.ndim
    cfg[axis] = (0, pad)
    return jnp.pad(x, cfg)


@functools.lru_cache(maxsize=1)
def _vmem_limit_bytes():
    """~75% of physical VMEM, capped at 96 MiB (v5e/v6e: 128 MiB, v7x: 64 MiB)."""
    try:
        cap = getattr(pltpu.get_tpu_info(), "vmem_capacity_bytes", None)
        if cap:
            return max(32 * 1024 * 1024,
                       min(int(cap) * 3 // 4, 96 * 1024 * 1024))
    except Exception:
        pass
    return 32 * 1024 * 1024


def _cparams(dims):
    return pltpu.CompilerParams(dimension_semantics=dims,
                                vmem_limit_bytes=_vmem_limit_bytes())


def _row_tile(total, target=1024):
    """Largest multiple-of-8 divisor of `total` <= target, else `total`
    (a full-extent block is always layout-legal)."""
    best = None
    d = 8
    hi = min(total, target)
    while d <= hi:
        if total % d == 0:
            best = d
        d += 8
    return best if best is not None else total


def _pick_band(Ho, Wo, target_rows):
    """Band height Hb: divides Ho and Hb*Wo is lane/sublane friendly
    ((Hb*Wo) % 8 == 0 or Hb == Ho), with Hb*Wo <= target_rows if possible."""
    best = Ho
    hi = min(Ho, max(1, target_rows // max(1, Wo)))
    for hb in range(1, hi + 1):
        if Ho % hb == 0 and ((hb * Wo) % 8 == 0 or hb == Ho):
            best = hb
    return best


def _stable_sigmoid(x):
    e = jnp.exp(-jnp.abs(x))
    return jnp.where(x >= 0, 1.0 / (1.0 + e), e / (1.0 + e))


def _fold_bn_into(w, conv_b, bn):
    """Fold eval-mode BN into weight columns; return (w_folded, shift)."""
    scale = bn["gamma"] / jnp.sqrt(bn["var"] + EPS)
    w_f = w * scale[None, :]
    shift = (conv_b - bn["mean"]) * scale + bn["beta"]
    return w_f, shift


# ----------------------------------------------------------------------------
# Kernel A: 1x1 conv as matmul + per-channel shift + optional ReLU (bf16 MXU).
# ----------------------------------------------------------------------------
def _mm_bias_act_kernel(x_ref, w_ref, b_ref, o_ref, *, act):
    y = jnp.dot(x_ref[...], w_ref[...], preferred_element_type=jnp.float32)
    y = y + b_ref[...]
    if act == "relu":
        y = jnp.maximum(y, 0.0)
    o_ref[...] = y.astype(o_ref.dtype)


def mm_bias_act(x, w, shift, act="none", out_dtype=jnp.bfloat16, tm_target=1024):
    M, K = x.shape
    _, Nc = w.shape
    tm = _row_tile(M, tm_target)           # exact divisor -> no row padding copy
    shift2 = shift.reshape(1, Nc).astype(jnp.float32)
    return pl.pallas_call(
        functools.partial(_mm_bias_act_kernel, act=act),
        out_shape=jax.ShapeDtypeStruct((M, Nc), out_dtype),
        grid_spec=pltpu.PrefetchScalarGridSpec(
            num_scalar_prefetch=0,
            grid=(M // tm,),
            in_specs=[
                pl.BlockSpec((tm, K), lambda i: (i, 0)),
                pl.BlockSpec((K, Nc), lambda i: (0, 0)),
                pl.BlockSpec((1, Nc), lambda i: (0, 0)),
            ],
            out_specs=pl.BlockSpec((tm, Nc), lambda i: (i, 0)),
        ),
        compiler_params=_cparams(("parallel",)),
    )(x, w, shift2)


# ----------------------------------------------------------------------------
# Kernel B: band-tiled 3x3 conv + shift + ReLU, fused SE squeeze + excitation.
# ----------------------------------------------------------------------------
def _conv2_se_kernel(xpad_hbm, wk_ref, s2_ref, w3_ref, s3_ref,
                     wse1_ref, bse1_ref, wse2_ref, bse2_ref,
                     h2_ref, gate_ref,
                     slab, sem, acc_ref, msum_ref,
                     *, Hb, Wo, stride, rows_in, inv_hw):
    n = pl.program_id(0)
    b = pl.program_id(1)
    NB = pl.num_programs(1)
    slot = lax.rem(b, 2)

    def _issue(band, sl):
        pltpu.make_async_copy(
            xpad_hbm.at[n, pl.ds(band * (Hb * stride), rows_in)],
            slab.at[sl], sem.at[sl]).start()

    # Prime the first band of this image.  The prefetch chain is kept entirely
    # within one image so the N grid axis stays megacore-safe ("parallel").
    @pl.when(b == 0)
    def _():
        _issue(0, 0)

    # Wait for the current band's halo slab.
    pltpu.make_async_copy(
        xpad_hbm.at[n, pl.ds(b * (Hb * stride), rows_in)],
        slab.at[slot], sem.at[slot]).wait()

    # Prefetch the next band while we compute this one.
    @pl.when(b + 1 < NB)
    def _():
        _issue(b + 1, 1 - slot)

    x = slab[slot]                                   # (rows_in, Wp2, Cp) bf16
    Cp = x.shape[-1]

    # Partial im2col along kx, built once per band: (rows_in, Wo, 3*Cp).
    cols = [
        lax.slice(x, (0, kx, 0),
                  (rows_in, kx + (Wo - 1) * stride + 1, Cp),
                  (1, stride, 1))
        for kx in range(3)
    ]
    xc = jnp.concatenate(cols, axis=-1)

    # 3 ky taps, each a K = 3*Cp MXU matmul, accumulated in a VMEM scratch.
    for ky in range(3):
        rows = lax.slice(xc, (ky, 0, 0),
                         (ky + (Hb - 1) * stride + 1, Wo, 3 * Cp),
                         (stride, 1, 1))             # (Hb, Wo, 3*Cp)
        mm = jnp.dot(rows.reshape(Hb * Wo, 3 * Cp), wk_ref[ky],
                     preferred_element_type=jnp.float32)
        if ky == 0:
            acc_ref[...] = mm
        else:
            acc_ref[...] = acc_ref[...] + mm

    h2 = jnp.maximum(acc_ref[...] + s2_ref[...], 0.0)        # (Hb*Wo, Cp) f32
    h2_ref[0] = h2.astype(h2_ref.dtype)

    # Per-image spatial sum for the SE squeeze (kept in f32, pre-bf16-rounding).
    @pl.when(b == 0)
    def _():
        msum_ref[...] = jnp.zeros_like(msum_ref)

    msum_ref[...] = msum_ref[...] + jnp.sum(h2, axis=0, keepdims=True)

    # Finalize: mean(bn3(conv3(h2))) == mean(h2) @ W3 + s3 (linearity), then the
    # two SE FC layers.  NOTE: padded channels stay exactly zero through this
    # whole chain, so the nonzero sigmoid gate on padded lanes multiplies a
    # zero h3 in the epilogue and is harmless.
    @pl.when(b == NB - 1)
    def _():
        mean = msum_ref[...] * inv_hw                            # (1, Cp) f32
        ym = jnp.dot(mean.astype(jnp.bfloat16), w3_ref[...],
                     preferred_element_type=jnp.float32) + s3_ref[...]
        z = jnp.dot(ym, wse1_ref[...],
                    preferred_element_type=jnp.float32) + bse1_ref[...]
        z = z * _stable_sigmoid(z)                               # SiLU
        g = jnp.dot(z, wse2_ref[...],
                    preferred_element_type=jnp.float32) + bse2_ref[...]
        gate_ref[0] = _stable_sigmoid(g)


def conv2_bn_relu_se(h1pad, wk, s2, w3, s3, wse1, bse1, wse2, bse2,
                     Ho, Wo, stride, Hb):
    N, Hp2, Wp2, Cp = h1pad.shape
    Hidp = wse1.shape[-1]
    NB = Ho // Hb
    rows_in = (Hb - 1) * stride + 3
    HW = Ho * Wo
    kern = functools.partial(_conv2_se_kernel, Hb=Hb, Wo=Wo, stride=stride,
                             rows_in=rows_in, inv_hw=1.0 / float(HW))
    return pl.pallas_call(
        kern,
        out_shape=(jax.ShapeDtypeStruct((N, HW, Cp), jnp.bfloat16),
                   jax.ShapeDtypeStruct((N, 1, Cp), jnp.float32)),
        grid_spec=pltpu.PrefetchScalarGridSpec(
            num_scalar_prefetch=0,
            grid=(N, NB),
            in_specs=[
                pl.BlockSpec(memory_space=pl.ANY),                   # h1pad HBM
                pl.BlockSpec((3, 3 * Cp, Cp), lambda n, b: (0, 0, 0)),
                pl.BlockSpec((1, Cp), lambda n, b: (0, 0)),
                pl.BlockSpec((Cp, Cp), lambda n, b: (0, 0)),
                pl.BlockSpec((1, Cp), lambda n, b: (0, 0)),
                pl.BlockSpec((Cp, Hidp), lambda n, b: (0, 0)),
                pl.BlockSpec((1, Hidp), lambda n, b: (0, 0)),
                pl.BlockSpec((Hidp, Cp), lambda n, b: (0, 0)),
                pl.BlockSpec((1, Cp), lambda n, b: (0, 0)),
            ],
            out_specs=[
                pl.BlockSpec((1, Hb * Wo, Cp), lambda n, b: (n, b, 0)),
                pl.BlockSpec((1, 1, Cp), lambda n, b: (n, 0, 0)),
            ],
            scratch_shapes=[
                pltpu.VMEM((2, rows_in, Wp2, Cp), jnp.bfloat16),   # slab (2-buf)
                pltpu.SemaphoreType.DMA((2,)),
                pltpu.VMEM((Hb * Wo, Cp), jnp.float32),            # accumulator
                pltpu.VMEM((1, Cp), jnp.float32),                  # spatial sum
            ],
        ),
        compiler_params=_cparams(("parallel", "arbitrary")),
    )(h1pad, wk, s2, w3, s3, wse1, bse1, wse2, bse2)


# ----------------------------------------------------------------------------
# Kernel E: epilogue  out = relu(conv3(h2)*gate + shortcut), bf16 output.
# conv3 is recomputed per tile so h3 never round-trips HBM; the projection
# shortcut 1x1 conv is also computed in-kernel.
# ----------------------------------------------------------------------------
def _epilogue_proj_kernel(h2_ref, g_ref, w3_ref, s3_ref,
                          xs_ref, wsc_ref, ssc_ref, o_ref):
    h3 = jnp.dot(h2_ref[0], w3_ref[...],
                 preferred_element_type=jnp.float32) + s3_ref[...]
    sc = jnp.dot(xs_ref[0], wsc_ref[...],
                 preferred_element_type=jnp.float32) + ssc_ref[...]
    y = h3 * g_ref[0] + sc
    o_ref[0] = jnp.maximum(y, 0.0).astype(o_ref.dtype)


def _epilogue_id_kernel(h2_ref, g_ref, w3_ref, s3_ref, xs_ref, o_ref):
    h3 = jnp.dot(h2_ref[0], w3_ref[...],
                 preferred_element_type=jnp.float32) + s3_ref[...]
    y = h3 * g_ref[0] + xs_ref[0].astype(jnp.float32)
    o_ref[0] = jnp.maximum(y, 0.0).astype(o_ref.dtype)


def se_residual_epilogue(h2, gate, w3, s3, xs, wsc=None, ssc=None,
                         thw_target=1024):
    N, HW, Cp = h2.shape
    thw = _row_tile(HW, thw_target)
    nblk = HW // thw
    cparams = _cparams(("parallel", "parallel"))
    out_shape = jax.ShapeDtypeStruct((N, HW, Cp), jnp.bfloat16)

    if wsc is None:   # identity shortcut
        return pl.pallas_call(
            _epilogue_id_kernel,
            out_shape=out_shape,
            grid_spec=pltpu.PrefetchScalarGridSpec(
                num_scalar_prefetch=0, grid=(N, nblk),
                in_specs=[
                    pl.BlockSpec((1, thw, Cp), lambda n, j: (n, j, 0)),
                    pl.BlockSpec((1, 1, Cp), lambda n, j: (n, 0, 0)),
                    pl.BlockSpec((Cp, Cp), lambda n, j: (0, 0)),
                    pl.BlockSpec((1, Cp), lambda n, j: (0, 0)),
                    pl.BlockSpec((1, thw, Cp), lambda n, j: (n, j, 0)),
                ],
                out_specs=pl.BlockSpec((1, thw, Cp), lambda n, j: (n, j, 0)),
            ),
            compiler_params=cparams,
        )(h2, gate, w3, s3, xs)

    Cin_p = xs.shape[-1]
    return pl.pallas_call(
        _epilogue_proj_kernel,
        out_shape=out_shape,
        grid_spec=pltpu.PrefetchScalarGridSpec(
            num_scalar_prefetch=0, grid=(N, nblk),
            in_specs=[
                pl.BlockSpec((1, thw, Cp), lambda n, j: (n, j, 0)),
                pl.BlockSpec((1, 1, Cp), lambda n, j: (n, 0, 0)),
                pl.BlockSpec((Cp, Cp), lambda n, j: (0, 0)),
                pl.BlockSpec((1, Cp), lambda n, j: (0, 0)),
                pl.BlockSpec((1, thw, Cin_p), lambda n, j: (n, j, 0)),
                pl.BlockSpec((Cin_p, Cp), lambda n, j: (0, 0)),
                pl.BlockSpec((1, Cp), lambda n, j: (0, 0)),
            ],
            out_specs=pl.BlockSpec((1, thw, Cp), lambda n, j: (n, j, 0)),
        ),
        compiler_params=cparams,
    )(h2, gate, w3, s3, xs, wsc, ssc)


# ----------------------------------------------------------------------------
# Parameter setup + forward wrapper.
# ----------------------------------------------------------------------------
def init_params(key, input_channels, num_channels, reduction_ratio=4):
    C_in, C = input_channels, num_channels
    H = C // reduction_ratio
    keys = jax.random.split(key, 16)

    def nrm(k, shape, s=0.1):
        return jax.random.normal(k, shape, jnp.float32) * s

    def bn_params(k):
        k1, k2, k3, k4 = jax.random.split(k, 4)
        return {
            "gamma": 1.0 + nrm(k1, (C,)),
            "beta": nrm(k2, (C,)),
            "mean": nrm(k3, (C,)),
            "var": 0.5 + jax.random.uniform(k4, (C,), jnp.float32),
        }

    return {
        "conv1_w": nrm(keys[0], (C, C_in, 1, 1)), "conv1_b": nrm(keys[1], (C,)),
        "conv2_w": nrm(keys[2], (C, C, 3, 3)),    "conv2_b": nrm(keys[3], (C,)),
        "conv3_w": nrm(keys[4], (C, C, 1, 1)),    "conv3_b": nrm(keys[5], (C,)),
        "bn1": bn_params(keys[6]), "bn2": bn_params(keys[7]), "bn3": bn_params(keys[8]),
        "sc_w": nrm(keys[9], (C, C_in, 1, 1)),    "sc_b": nrm(keys[10], (C,)),
        "bn_sc": bn_params(keys[11]),
        "se_w1": nrm(keys[12], (H, C)), "se_b1": nrm(keys[13], (H,)),
        "se_w2": nrm(keys[14], (C, H)), "se_b2": nrm(keys[15], (C,)),
    }


def se_bottleneck_forward(x_nchw, params, stride=1,
                          conv2_band_rows=1024, row_tile=1024):
    N, C_in, Hs, Ws = x_nchw.shape
    C = params["conv1_w"].shape[0]
    hid = params["se_w1"].shape[0]
    Cp = _round_up(C, LANE)
    Cin_p = _round_up(C_in, LANE)
    Hidp = _round_up(hid, LANE)

    # Cast to bf16 *before* the transpose / channel pad (halves XLA pre-pass).
    x = jnp.transpose(x_nchw.astype(jnp.bfloat16), (0, 2, 3, 1))   # NHWC bf16
    xpC = _pad_axis(x, 3, Cin_p)                                   # (N,H,W,Cin_p)

    # ---- conv1 (1x1) + bn1 + relu ----------------------------------------
    w1 = params["conv1_w"].reshape(C, C_in).T
    w1, s1 = _fold_bn_into(w1, params["conv1_b"], params["bn1"])
    w1p = _pad_axis(_pad_axis(w1, 0, Cin_p), 1, Cp).astype(jnp.bfloat16)
    s1p = _pad_axis(s1, 0, Cp)
    h1 = mm_bias_act(xpC.reshape(N * Hs * Ws, Cin_p), w1p, s1p,
                     act="relu", out_dtype=jnp.bfloat16, tm_target=row_tile)
    h1 = h1.reshape(N, Hs, Ws, Cp)

    # ---- conv2 (3x3) + bn2 + relu, fused SE squeeze + excitation ----------
    # TODO(synk): the spatial halo pad below is still one XLA-level bf16 copy
    # of h1; it could be folded into the band DMA with boundary masking.
    h1pad = jnp.pad(h1, ((0, 0), (1, 1), (1, 1), (0, 0)))
    Ho = (Hs + 2 - 3) // stride + 1
    Wo = (Ws + 2 - 3) // stride + 1
    Hb = _pick_band(Ho, Wo, conv2_band_rows)

    w2 = jnp.transpose(params["conv2_w"], (2, 3, 1, 0))            # (ky,kx,I,O)
    scale2 = params["bn2"]["gamma"] / jnp.sqrt(params["bn2"]["var"] + EPS)
    w2 = w2 * scale2[None, None, None, :]
    s2 = (params["conv2_b"] - params["bn2"]["mean"]) * scale2 + params["bn2"]["beta"]
    w2p = _pad_axis(_pad_axis(w2, 2, Cp), 3, Cp)                   # (3,3,Cp,Cp)
    wk = w2p.reshape(3, 3 * Cp, Cp).astype(jnp.bfloat16)           # kx-major K
    s2p = _pad_axis(s2, 0, Cp).reshape(1, Cp).astype(jnp.float32)

    w3 = params["conv3_w"].reshape(C, C).T
    w3, s3 = _fold_bn_into(w3, params["conv3_b"], params["bn3"])
    w3p = _pad_axis(_pad_axis(w3, 0, Cp), 1, Cp).astype(jnp.bfloat16)
    s3p = _pad_axis(s3, 0, Cp).reshape(1, Cp).astype(jnp.float32)

    wse1 = _pad_axis(_pad_axis(params["se_w1"].T, 0, Cp), 1, Hidp).astype(jnp.float32)
    bse1 = _pad_axis(params["se_b1"], 0, Hidp).reshape(1, Hidp).astype(jnp.float32)
    wse2 = _pad_axis(_pad_axis(params["se_w2"].T, 0, Hidp), 1, Cp).astype(jnp.float32)
    bse2 = _pad_axis(params["se_b2"], 0, Cp).reshape(1, Cp).astype(jnp.float32)

    h2, gate = conv2_bn_relu_se(h1pad, wk, s2p, w3p, s3p,
                                wse1, bse1, wse2, bse2, Ho, Wo, stride, Hb)

    # ---- epilogue: conv3 recompute + gate + shortcut + relu ---------------
    HW = Ho * Wo
    if stride != 1 or C_in != C:
        xs = xpC[:, ::stride, ::stride, :].reshape(N, HW, Cin_p)
        wsc = params["sc_w"].reshape(C, C_in).T
        wsc, ssc = _fold_bn_into(wsc, params["sc_b"], params["bn_sc"])
        wscp = _pad_axis(_pad_axis(wsc, 0, Cin_p), 1, Cp).astype(jnp.bfloat16)
        sscp = _pad_axis(ssc, 0, Cp).reshape(1, Cp).astype(jnp.float32)
        out = se_residual_epilogue(h2, gate, w3p, s3p, xs, wscp, sscp,
                                   thw_target=row_tile)
    else:
        xs = xpC.reshape(N, HW, Cp)
        out = se_residual_epilogue(h2, gate, w3p, s3p, xs,
                                   thw_target=row_tile)

    out = out[:, :, :C].reshape(N, Ho, Wo, C)
    return jnp.transpose(out, (0, 3, 1, 2)).astype(jnp.float32)    # NCHW f32


# ----------------------------------------------------------------------------
# Pure-JAX reference (eval-mode BN) for correctness check.
# ----------------------------------------------------------------------------
def ref_forward(x, params, stride=1):
    def bn(h, p):
        s = p["gamma"] / jnp.sqrt(p["var"] + EPS)
        return (h - p["mean"][None, :, None, None]) * s[None, :, None, None] \
            + p["beta"][None, :, None, None]

    def conv(h, w, b, st=1, pad=0):
        o = jax.lax.conv_general_dilated(
            h, w, (st, st), [(pad, pad), (pad, pad)],
            dimension_numbers=("NCHW", "OIHW", "NCHW"))
        return o + b[None, :, None, None]

    h = jax.nn.relu(bn(conv(x, params["conv1_w"], params["conv1_b"]), params["bn1"]))
    h = jax.nn.relu(bn(conv(h, params["conv2_w"], params["conv2_b"], stride, 1), params["bn2"]))
    h = bn(conv(h, params["conv3_w"], params["conv3_b"]), params["bn3"])
    y = h.mean(axis=(-1, -2))
    z = jax.nn.silu(y @ params["se_w1"].T + params["se_b1"])
    g = jax.nn.sigmoid(z @ params["se_w2"].T + params["se_b2"])
    h = h * g[:, :, None, None]
    if stride != 1 or x.shape[1] != h.shape[1]:
        sc = bn(conv(x, params["sc_w"], params["sc_b"], stride), params["bn_sc"])
    else:
        sc = x
    return jax.nn.relu(h + sc)


if __name__ == "__main__":
    key = jax.random.PRNGKey(0)
    N, Hs, Ws = 2, 16, 16
    # (C_in, C, stride, conv2_band_rows): exercises projection + multi-band
    # double-buffering, strided conv bands, and the identity-shortcut path.
    configs = [
        (4, 8, 1, 128),
        (4, 8, 2, 32),
        (8, 8, 1, 128),
    ]
    for idx, (C_in, C, stride, band_rows) in enumerate(configs):
        k_x, k_p = jax.random.split(jax.random.fold_in(key, idx))
        x = jax.random.normal(k_x, (N, C_in, Hs, Ws), jnp.float32)
        params = init_params(k_p, C_in, C, 4)

        out = jax.block_until_ready(
            se_bottleneck_forward(x, params, stride=stride,
                                  conv2_band_rows=band_rows))
        ref = jax.block_until_ready(ref_forward(x, params, stride=stride))

        assert out.shape == ref.shape, (idx, out.shape, ref.shape)
        max_err = float(jnp.max(jnp.abs(out - ref)))
        # bf16 matmuls / bf16 activation storage -> relaxed tolerance vs f32 ref
        assert max_err < 6e-2, (idx, max_err)

    print("KERNEL_OK")
</pallas_src>

<mosaic_0001>
module attributes {stable_mosaic.version = 11 : i64} {
  func.func @_mm_bias_act_kernel(%arg0: i32, %arg1: memref<512x128xbf16, #tpu.memory_space<vmem>>, %arg2: memref<128x128xbf16, #tpu.memory_space<vmem>>, %arg3: memref<1x128xf32, #tpu.memory_space<vmem>>, %arg4: memref<512x128xbf16, #tpu.memory_space<vmem>>) attributes {dimension_semantics = [#tpu.dimension_semantics<parallel>], iteration_bounds = array<i64: 1>, scalar_prefetch = 0 : i64, scratch_operands = 0 : i64, tpu.core_type = #tpu.core_type<tc>, window_params = [{transform_indices = @transform_0, window_bounds = array<i64: 512, 128>}, {pipeline_mode = #tpu.pipeline_mode<synchronous>, transform_indices = @transform_1, window_bounds = array<i64: 128, 128>}, {pipeline_mode = #tpu.pipeline_mode<synchronous>, transform_indices = @transform_2, window_bounds = array<i64: 1, 128>}, {transform_indices = @transform_3, window_bounds = array<i64: 512, 128>}]} {
    %c0 = arith.constant 0 : index
    %c0_0 = arith.constant 0 : index
    %0 = vector.load %arg1[%c0, %c0_0] : memref<512x128xbf16, #tpu.memory_space<vmem>>, vector<512x128xbf16>
    %c0_1 = arith.constant 0 : index
    %c0_2 = arith.constant 0 : index
    %1 = vector.load %arg2[%c0_1, %c0_2] : memref<128x128xbf16, #tpu.memory_space<vmem>>, vector<128x128xbf16>
    %cst = arith.constant dense<0.000000e+00> : vector<512x128xf32>
    %2 = tpu.matmul %0, %1, %cst {dimension_numbers = #tpu.dot_dimension_numbers<[1], [0], [0], [1], [0, 0, 1, 1], [], []>} : vector<512x128xbf16>, vector<128x128xbf16>, vector<512x128xf32> -> vector<512x128xf32>
    %c0_3 = arith.constant 0 : index
    %c0_4 = arith.constant 0 : index
    %3 = vector.load %arg3[%c0_3, %c0_4] : memref<1x128xf32, #tpu.memory_space<vmem>>, vector<1x128xf32>
    %4 = vector.broadcast %3 : vector<1x128xf32> to vector<512x128xf32>
    %5 = arith.addf %2, %4 : vector<512x128xf32>
    %cst_5 = arith.constant 0.000000e+00 : f32
    %6 = vector.broadcast %cst_5 : f32 to vector<512x128xf32>
    %7 = arith.maximumf %5, %6 : vector<512x128xf32>
    %8 = arith.truncf %7 : vector<512x128xf32> to vector<512x128xbf16>
    %c0_6 = arith.constant 0 : index
    %c0_7 = arith.constant 0 : index
    %9 = vector.load %arg4[%c0_6, %c0_7] : memref<512x128xbf16, #tpu.memory_space<vmem>>, vector<512x128xbf16>
    tpu.vector_store %arg4[%c0_6, %c0_7], %8 {strides = array<i32>} : memref<512x128xbf16, #tpu.memory_space<vmem>>, vector<512x128xbf16>,
    return
  }
  func.func @transform_0(%arg0: i32) -> (i32, i32) {
    %c0_i32 = arith.constant 0 : i32
    %c0_i32_0 = arith.constant 0 : i32
    return %arg0, %c0_i32 : i32, i32
  }
  func.func @transform_1(%arg0: i32) -> (i32, i32) {
    %c0_i32 = arith.constant 0 : i32
    %c0_i32_0 = arith.constant 0 : i32
    %c0_i32_1 = arith.constant 0 : i32
    return %c0_i32, %c0_i32_0 : i32, i32
  }
  func.func @transform_2(%arg0: i32) -> (i32, i32) {
    %c0_i32 = arith.constant 0 : i32
    %c0_i32_0 = arith.constant 0 : i32
    %c0_i32_1 = arith.constant 0 : i32
    return %c0_i32, %c0_i32_0 : i32, i32
  }
  func.func @transform_3(%arg0: i32) -> (i32, i32) {
    %c0_i32 = arith.constant 0 : i32
    %c0_i32_0 = arith.constant 0 : i32
    return %arg0, %c0_i32 : i32, i32
  }
}

</mosaic_0001>

<bundles_post_ra>
// kernel: tpu_custom_call.1
= control target key start
LH: loop header
LB: loop body
LE: loop exit
PB: predicated region body
PF: predicated region fallthrough
CT: control target
= control target key end

     0   :  { %8 = vsyncpa [#allocation3], 0  ;;  %s1814_s0 = inlined_call_operand.hbm [shape: bf16[512,128], index: 0, kind: input, shape index: {}]   ;;  %s1815_s1 = inlined_call_operand.hbm [shape: bf16[128,128], index: 1, kind: input, shape index: {}]   ;;  %s1816_s2 = inlined_call_operand.vmem [shape: f32[1,128], index: 2, kind: input, shape index: {}]   ;;  %s1817_s3 = inlined_call_operand.hbm [shape: bf16[512,128], index: 3, kind: output, shape index: {}]  }
   0x1   :  { %9 = vsyncpa [#allocation6], 0 }
   0x2   :  { %10 = vsyncpa [#allocation4], 0  ;;  %s1675_s12 = smov [#allocation2]   ;;  %s1603_s16 = scalar_lea.hbm %s1814_s0, 4096 }
   0x3   :  { %s16_s13 = sshll.u32 %s1675_s12, 4  ;;  %p1604_p0 = scmp.ne.s32.totalorder %s1814_s0, %s1603_s16  ;;  %s17_s13 = int_to_ptr.vmem [resolvable:$true] %s16_s13 }
   0x4   :  { %p1607_p1 = scmp.lt.u32.totalorder %s1603_s16, %s1814_s0 }
   0x6   :  { %p1609_p2 = pnand %p1607_p1, %p1604_p0 }
   0x8   :  { %1612 = shalt.err (!%p1609_p2)
}
   0x9   :  { %s1613_s21 = scalar_lea.vmem %s17_s13, 4096  ;;  %p1618_p4 = scmp.lt.s32.totalorder %s17_s13, %s17_s13 }
   0xa   :  { %p1614_p3 = scmp.ne.s32.totalorder %s17_s13, %s1613_s21  ;;  %p1619_p5 = scmp.lt.s32.totalorder %s1613_s21, %s1613_s21 }
   0xc   :  { %p1620_p6 = por %p1619_p5, %p1618_p4 }
   0xe   :  { %p1621_p7 = pnand %p1620_p6, %p1614_p3 }
  0x10   :  { %1624 = shalt.err (!%p1621_p7)
}
  0x11   :  { %s1676_s22 = smov 64   ;;  %s1677_s23 = smov 4  }
  0x12   :  { %22 = dma.hbm_to_vmem [thread:$0]  %s1814_s0, 4096, %s17_s13, [#allocation3], %s1676_s22, %s1676_s22, %s1677_s23  }
  0x13   :  { %s1678_s26 = smov [#allocation5]   ;;  %s1625_s30 = scalar_lea.hbm %s1815_s1, 1024 }
  0x14   :  { %s28_s27 = sshll.u32 %s1678_s26, 4  ;;  %p1626_p8 = scmp.ne.s32.totalorder %s1815_s1, %s1625_s30  ;;  %s29_s27 = int_to_ptr.vmem [resolvable:$true] %s28_s27 }
  0x15   :  { %p1629_p9 = scmp.lt.u32.totalorder %s1625_s30, %s1815_s1 }
  0x17   :  { %p1631_p10 = pnand %p1629_p9, %p1626_p8 }
  0x19   :  { %1634 = shalt.err (!%p1631_p10)
}
  0x1a   :  { %s1635_s8 = scalar_lea.vmem %s29_s27, 1024  ;;  %p1640_p12 = scmp.lt.s32.totalorder %s29_s27, %s29_s27 }
  0x1b   :  { %p1636_p11 = scmp.ne.s32.totalorder %s29_s27, %s1635_s8  ;;  %p1641_p13 = scmp.lt.s32.totalorder %s1635_s8, %s1635_s8 }
  0x1d   :  { %p1642_p0 = por %p1641_p13, %p1640_p12 }
  0x1f   :  { %p1643_p1 = pnand %p1642_p0, %p1636_p11 }
  0x21   :  { %1646 = shalt.err (!%p1643_p1)
}
  0x22   :  { %34 = dma.hbm_to_vmem [thread:$0]  %s1815_s1, 1024, %s29_s27, [#allocation6], %s1676_s22, %s1676_s22, %s1677_s23  }
  0x23   :  { %1669 = dma.done.wait [#allocation3], 4096  }
  0x24   :  { %1670 = vsyncadd [#allocation3], 4294963200 }
  0x25   :  { %1671 = dma.done.wait [#allocation6], 1024  }
  0x26   :  { %1672 = vsyncadd [#allocation6], 4294966272  ;;  %v1563_v0 = vld [vmem:[#allocation5] sm:$0xff]   ;;  %v1564_v1 = vld [vmem:[#allocation5 + $0x8] sm:$0xff]  }
  0x27   :  { %1462 = vmatprep.subr.bf16.mxu0 %v1563_v0  ;;  %1542 = vmatprep.subr.bf16.mxu1 %v1563_v0  ;;  %v1565_v2 = vld [vmem:[#allocation5 + $0x10] sm:$0xff]   ;;  %v1566_v3 = vld [vmem:[#allocation5 + $0x18] sm:$0xff]   ;;  %v1571_v4 = vld [vmem:[#allocation2] sm:$0xff]  }
  0x28   :  { %1463 = vmatpush3.bf16.msra.mxu0 %v1563_v0  ;;  %1550 = vmatpush3.bf16.msra.mxu1 %v1563_v0  ;;  %v1572_v5 = vld [vmem:[#allocation2 + $0x80] sm:$0xff]   ;;  %v1568_v7 = vld [vmem:[#allocation5 + $0x28] sm:$0xff]   ;;  %v1569_v8 = vld [vmem:[#allocation5 + $0x30] sm:$0xff]  }
  0x29   :  { %1464 = vmatprep.subr.bf16.mxu0 %v1564_v1  ;;  %1543 = vmatprep.subr.bf16.mxu1 %v1564_v1  ;;  %v1567_v6 = vld [vmem:[#allocation5 + $0x20] sm:$0xff]   ;;  %v1570_v9 = vld [vmem:[#allocation5 + $0x38] sm:$0xff]   ;;  %v1573_v10 = vld [vmem:[#allocation2 + $0x8] sm:$0xff]  }
  0x2a   :  { %1478 = vmatprep.mubr.bf16.mxu0 %v1571_v4  ;;  %1510 = vmatprep.mubr.bf16.mxu1 %v1572_v5  ;;  %v1574_v11 = vld [vmem:[#allocation2 + $0x88] sm:$0xff]   ;;  %v1575_v12 = vld [vmem:[#allocation2 + $0x10] sm:$0xff]   ;;  %v1577_v14 = vld [vmem:[#allocation2 + $0x18] sm:$0xff]  }
  0x2b   :  { %v1576_v13 = vld [vmem:[#allocation2 + $0x90] sm:$0xff]   ;;  %v1578_v15 = vld [vmem:[#allocation2 + $0x98] sm:$0xff]   ;;  %v1579_v16 = vld [vmem:[#allocation2 + $0x20] sm:$0xff]  }
  0x2c   :  { %1465 = vmatpush3.bf16.msra.mxu0 %v1564_v1  ;;  %1551 = vmatpush3.bf16.msra.mxu1 %v1564_v1  ;;  %v1580_v17 = vld [vmem:[#allocation2 + $0xa0] sm:$0xff]   ;;  %v1581_v18 = vld [vmem:[#allocation2 + $0x28] sm:$0xff]   ;;  %v1583_v20 = vld [vmem:[#allocation2 + $0x30] sm:$0xff]  }
  0x2d   :  { %1466 = vmatprep.subr.bf16.mxu0 %v1565_v2  ;;  %1544 = vmatprep.subr.bf16.mxu1 %v1565_v2  ;;  %v1582_v19 = vld [vmem:[#allocation2 + $0xa8] sm:$0xff]   ;;  %v1584_v21 = vld [vmem:[#allocation2 + $0xb0] sm:$0xff]   ;;  %v1585_v22 = vld [vmem:[#allocation2 + $0x38] sm:$0xff]  }
  0x2e   :  { %v1586_v23 = vld [vmem:[#allocation2 + $0xb8] sm:$0xff]   ;;  %v1587_v24 = vld [vmem:[#allocation2 + $0x40] sm:$0xff]   ;;  %v1589_v26 = vld [vmem:[#allocation2 + $0x48] sm:$0xff]  }
  0x2f   :  { %v1588_v25 = vld [vmem:[#allocation2 + $0xc0] sm:$0xff]   ;;  %v1590_v27 = vld [vmem:[#allocation2 + $0xc8] sm:$0xff]   ;;  %v1591_v28 = vld [vmem:[#allocation2 + $0x50] sm:$0xff]  }
  0x30   :  { %1467 = vmatpush3.bf16.msra.mxu0 %v1565_v2  ;;  %1552 = vmatpush3.bf16.msra.mxu1 %v1565_v2  ;;  %v1592_v29 = vld [vmem:[#allocation2 + $0xd0] sm:$0xff]   ;;  %v1593_v30 = vld [vmem:[#allocation2 + $0x58] sm:$0xff]   ;;  %v1595_v32 = vld [vmem:[#allocation2 + $0x60] sm:$0xff]  }
  0x31   :  { %1468 = vmatprep.subr.bf16.mxu0 %v1566_v3  ;;  %1545 = vmatprep.subr.bf16.mxu1 %v1566_v3  ;;  %v1594_v31 = vld [vmem:[#allocation2 + $0xd8] sm:$0xff]   ;;  %v1596_v33 = vld [vmem:[#allocation2 + $0xe0] sm:$0xff]   ;;  %v1597_v34 = vld [vmem:[#allocation2 + $0x68] sm:$0xff]  }
  0x32   :  { %v1598_v35 = vld [vmem:[#allocation2 + $0xe8] sm:$0xff]   ;;  %v1599_v36 = vld [vmem:[#allocation2 + $0x70] sm:$0xff]   ;;  %v1601_v38 = vld [vmem:[#allocation2 + $0x78] sm:$0xff]  }
  0x33   :  { %v1600_v37 = vld [vmem:[#allocation2 + $0xf0] sm:$0xff]   ;;  %v1602_v39 = vld [vmem:[#allocation2 + $0xf8] sm:$0xff]   ;;  %v1733_v40 = vld [vmem:[%s1816_s2] ss:$0 sm:$0xff]  ;;  %s1679_s2 = smov [#allocation7]  }
  0x34   :  { %1469 = vmatpush3.bf16.msra.mxu0 %v1566_v3  ;;  %1553 = vmatpush3.bf16.msra.mxu1 %v1566_v3  ;;  %s1049_s11 = sshll.u32 %s1679_s2, 4  ;;  %s1050_s11 = int_to_ptr.vmem [resolvable:$true] %s1049_s11 }
  0x35   :  { %1470 = vmatprep.subr.bf16.mxu0 %v1567_v6  ;;  %1546 = vmatprep.subr.bf16.mxu1 %v1567_v6  ;;  %s1647_s12 = scalar_lea.vmem %s1050_s11, 4096  ;;  %p1652_p3 = scmp.lt.s32.totalorder %s1050_s11, %s1050_s11 }
  0x36   :  { %p1648_p2 = scmp.ne.s32.totalorder %s1050_s11, %s1647_s12  ;;  %p1653_p4 = scmp.lt.s32.totalorder %s1647_s12, %s1647_s12 }
  0x38   :  { %1471 = vmatpush3.bf16.msra.mxu0 %v1567_v6  ;;  %1554 = vmatpush3.bf16.msra.mxu1 %v1567_v6  ;;  %p1654_p5 = por %p1653_p4, %p1652_p3 }
  0x39   :  { %1472 = vmatprep.subr.bf16.mxu0 %v1568_v7  ;;  %1547 = vmatprep.subr.bf16.mxu1 %v1568_v7 }
  0x3a   :  { %p1655_p6 = pnand %p1654_p5, %p1648_p2 }
  0x3c   :  { %1473 = vmatpush3.bf16.msra.mxu0 %v1568_v7  ;;  %1555 = vmatpush3.bf16.msra.mxu1 %v1568_v7 }
  0x3d   :  { %1474 = vmatprep.subr.bf16.mxu0 %v1569_v8  ;;  %1548 = vmatprep.subr.bf16.mxu1 %v1569_v8 }
  0x40   :  { %1475 = vmatpush3.bf16.msra.mxu0 %v1569_v8  ;;  %1556 = vmatpush3.bf16.msra.mxu1 %v1569_v8 }
  0x41   :  { %1476 = vmatprep.subr.bf16.mxu0 %v1570_v9  ;;  %1549 = vmatprep.subr.bf16.mxu1 %v1570_v9 }
  0x44   :  { %1477 = vmatpush3.bf16.msra.mxu0 %v1570_v9  ;;  %1557 = vmatpush3.bf16.msra.mxu1 %v1570_v9 }
  0x47   :  { %1479 = vmatmul.mubr.bf16.vlgmr.msra.gmra.mrb[0].mxu0 %v1573_v10  ;;  %1511 = vmatmul.mubr.bf16.vlgmr.msra.gmra.mrb[0].mxu1 %v1574_v11 }
  0x48   :  { %1482 = vmatprep.mubr.bf16.mxu0 %v1575_v12  ;;  %1514 = vmatprep.mubr.bf16.mxu1 %v1576_v13 }
  0x4f   :  { %1483 = vmatmul.mubr.bf16.gmra.mrb[4].mxu0 %v1577_v14  ;;  %1515 = vmatmul.mubr.bf16.gmra.mrb[4].mxu1 %v1578_v15 }
  0x50   :  { %1486 = vmatprep.mubr.bf16.mxu0 %v1579_v16  ;;  %1518 = vmatprep.mubr.bf16.mxu1 %v1580_v17 }
  0x57   :  { %1487 = vmatmul.mubr.bf16.gmra.mrb[8].mxu0 %v1581_v18  ;;  %1519 = vmatmul.mubr.bf16.gmra.mrb[8].mxu1 %v1582_v19 }
  0x58   :  { %1490 = vmatprep.mubr.bf16.mxu0 %v1583_v20  ;;  %1522 = vmatprep.mubr.bf16.mxu1 %v1584_v21 }
  0x5f   :  { %1491 = vmatmul.mubr.bf16.gmra.mrb[12].mxu0 %v1585_v22  ;;  %1523 = vmatmul.mubr.bf16.gmra.mrb[12].mxu1 %v1586_v23 }
  0x60   :  { %1494 = vmatprep.mubr.bf16.mxu0 %v1587_v24  ;;  %1526 = vmatprep.mubr.bf16.mxu1 %v1588_v25 }
  0x67   :  { %1495 = vmatmul.mubr.bf16.gmra.mrb[16].mxu0 %v1589_v26  ;;  %1527 = vmatmul.mubr.bf16.gmra.mrb[16].mxu1 %v1590_v27 }
  0x68   :  { %1498 = vmatprep.mubr.bf16.mxu0 %v1591_v28  ;;  %1530 = vmatprep.mubr.bf16.mxu1 %v1592_v29 }
  0x6f   :  { %1499 = vmatmul.mubr.bf16.gmra.mrb[20].mxu0 %v1593_v30  ;;  %1531 = vmatmul.mubr.bf16.gmra.mrb[20].mxu1 %v1594_v31 }
  0x70   :  { %1502 = vmatprep.mubr.bf16.mxu0 %v1595_v32  ;;  %1534 = vmatprep.mubr.bf16.mxu1 %v1596_v33 }
  0x77   :  { %1503 = vmatmul.mubr.bf16.gmra.mrb[24].mxu0 %v1597_v34  ;;  %1535 = vmatmul.mubr.bf16.gmra.mrb[24].mxu1 %v1598_v35 }
  0x78   :  { %1506 = vmatprep.mubr.bf16.mxu0 %v1599_v36  ;;  %1538 = vmatprep.mubr.bf16.mxu1 %v1600_v37 }
  0x7f   :  { %1507 = vmatmul.mubr.bf16.gmra.mrb[28].mxu0 %v1601_v38  ;;  %1539 = vmatmul.mubr.bf16.gmra.mrb[28].mxu1 %v1602_v39 }
 0x11a   :  { %v1480_v41 = vpop.f32.mrb[0].mxu0  ;;  %v1512_v42 = vpop.f32.mrb[0].mxu1 }
 0x11b   :  { %v414_v43 = vadd.f32 %v1480_v41, %v1733_v40  ;;  %v542_v44 = vadd.f32 %v1512_v42, %v1733_v40  ;;  %v405_v45 = vpop.f32.mrb[1].mxu0  ;;  %v533_v46 = vpop.f32.mrb[1].mxu1 }
 0x11c   :  { %v406_v47 = vadd.f32 %v1733_v40, %v405_v45  ;;  %v534_v48 = vadd.f32 %v1733_v40, %v533_v46  ;;  %v1481_v49 = vpop.f32.mrb[2].mxu0  ;;  %v1513_v50 = vpop.f32.mrb[2].mxu1 }
 0x11d   :  { %v417_v51 = vadd.f32 %v1481_v49, %v1733_v40  ;;  %v545_v52 = vadd.f32 %v1513_v50, %v1733_v40  ;;  %v408_v53 = vpop.f32.mrb[3].mxu0  ;;  %v536_v54 = vpop.f32.mrb[3].mxu1  ;;  %v662_v57 = vmax.f32 %v414_v43, 0.0  ;;  %v694_v58 = vmax.f32 %v542_v44, 0.0 }
 0x11e   :  { %v409_v55 = vadd.f32 %v1733_v40, %v408_v53  ;;  %v537_v56 = vadd.f32 %v1733_v40, %v536_v54  ;;  %v660_v61 = vmax.f32 %v406_v47, 0.0  ;;  %v692_v62 = vmax.f32 %v534_v48, 0.0 }
 0x11f   :  { %v663_v59 = vmax.f32 %v417_v51, 0.0  ;;  %v695_v60 = vmax.f32 %v545_v52, 0.0 }
 0x120   :  { %v661_v63 = vmax.f32 %v409_v55, 0.0  ;;  %v693_v0 = vmax.f32 %v537_v56, 0.0 }
 0x121   :  { %v1239_v1 = vpack.c.bf16 %v663_v59, %v662_v57  ;;  %v1319_v2 = vpack.c.bf16 %v695_v60, %v694_v58 }
 0x122   :  { %v1234_v3 = vpack.c.bf16 %v661_v63, %v660_v61  ;;  %v1314_v4 = vpack.c.bf16 %v693_v0, %v692_v62  ;;  %v1484_v5 = vpop.f32.mrb[4].mxu0  ;;  %v1516_v6 = vpop.f32.mrb[4].mxu1 }
 0x123   :  { %1391 = vst [vmem:[#allocation7 + $0x8] sm:$0xff] %v1239_v1   ;;  %1407 = vst [vmem:[#allocation7 + $0x88] sm:$0xff] %v1319_v2   ;;  %v430_v7 = vadd.f32 %v1484_v5, %v1733_v40  ;;  %v558_v8 = vadd.f32 %v1516_v6, %v1733_v40  ;;  %v421_v9 = vpop.f32.mrb[5].mxu0  ;;  %v549_v10 = vpop.f32.mrb[5].mxu1 }
 0x124   :  { %1235 = vst [vmem:[#allocation7] sm:$0xff] %v1234_v3   ;;  %1406 = vst [vmem:[#allocation7 + $0x80] sm:$0xff] %v1314_v4   ;;  %v422_v11 = vadd.f32 %v1733_v40, %v421_v9  ;;  %v550_v12 = vadd.f32 %v1733_v40, %v549_v10  ;;  %v1485_v13 = vpop.f32.mrb[6].mxu0  ;;  %v1517_v14 = vpop.f32.mrb[6].mxu1 }
 0x125   :  { %v433_v15 = vadd.f32 %v1485_v13, %v1733_v40  ;;  %v561_v16 = vadd.f32 %v1517_v14, %v1733_v40  ;;  %v424_v17 = vpop.f32.mrb[7].mxu0  ;;  %v552_v18 = vpop.f32.mrb[7].mxu1  ;;  %v666_v21 = vmax.f32 %v430_v7, 0.0  ;;  %v698_v22 = vmax.f32 %v558_v8, 0.0 }
 0x126   :  { %v425_v19 = vadd.f32 %v1733_v40, %v424_v17  ;;  %v553_v20 = vadd.f32 %v1733_v40, %v552_v18  ;;  %v664_v25 = vmax.f32 %v422_v11, 0.0  ;;  %v696_v26 = vmax.f32 %v550_v12, 0.0 }
 0x127   :  { %v667_v23 = vmax.f32 %v433_v15, 0.0  ;;  %v699_v24 = vmax.f32 %v561_v16, 0.0 }
 0x128   :  { %v665_v27 = vmax.f32 %v425_v19, 0.0  ;;  %v697_v28 = vmax.f32 %v553_v20, 0.0 }
 0x129   :  { %v1249_v29 = vpack.c.bf16 %v667_v23, %v666_v21  ;;  %v1329_v30 = vpack.c.bf16 %v699_v24, %v698_v22 }
 0x12a   :  { %v1244_v31 = vpack.c.bf16 %v665_v27, %v664_v25  ;;  %v1324_v32 = vpack.c.bf16 %v697_v28, %v696_v26  ;;  %v1488_v33 = vpop.f32.mrb[8].mxu0  ;;  %v1520_v34 = vpop.f32.mrb[8].mxu1 }
 0x12b   :  { %1393 = vst [vmem:[#allocation7 + $0x18] sm:$0xff] %v1249_v29   ;;  %1409 = vst [vmem:[#allocation7 + $0x98] sm:$0xff] %v1329_v30   ;;  %v446_v35 = vadd.f32 %v1488_v33, %v1733_v40  ;;  %v574_v36 = vadd.f32 %v1520_v34, %v1733_v40  ;;  %v437_v37 = vpop.f32.mrb[9].mxu0  ;;  %v565_v38 = vpop.f32.mrb[9].mxu1 }
 0x12c   :  { %1392 = vst [vmem:[#allocation7 + $0x10] sm:$0xff] %v1244_v31   ;;  %1408 = vst [vmem:[#allocation7 + $0x90] sm:$0xff] %v1324_v32   ;;  %v438_v39 = vadd.f32 %v1733_v40, %v437_v37  ;;  %v566_v41 = vadd.f32 %v1733_v40, %v565_v38  ;;  %v1489_v42 = vpop.f32.mrb[10].mxu0  ;;  %v1521_v43 = vpop.f32.mrb[10].mxu1 }
 0x12d   :  { %v449_v44 = vadd.f32 %v1489_v42, %v1733_v40  ;;  %v577_v45 = vadd.f32 %v1521_v43, %v1733_v40  ;;  %v440_v46 = vpop.f32.mrb[11].mxu0  ;;  %v568_v47 = vpop.f32.mrb[11].mxu1  ;;  %v670_v50 = vmax.f32 %v446_v35, 0.0  ;;  %v702_v51 = vmax.f32 %v574_v36, 0.0 }
 0x12e   :  { %v441_v48 = vadd.f32 %v1733_v40, %v440_v46  ;;  %v569_v49 = vadd.f32 %v1733_v40, %v568_v47  ;;  %v668_v54 = vmax.f32 %v438_v39, 0.0  ;;  %v700_v55 = vmax.f32 %v566_v41, 0.0 }
 0x12f   :  { %v671_v52 = vmax.f32 %v449_v44, 0.0  ;;  %v703_v53 = vmax.f32 %v577_v45, 0.0 }
 0x130   :  { %v669_v56 = vmax.f32 %v441_v48, 0.0  ;;  %v701_v57 = vmax.f32 %v569_v49, 0.0 }
 0x131   :  { %v1259_v58 = vpack.c.bf16 %v671_v52, %v670_v50  ;;  %v1339_v59 = vpack.c.bf16 %v703_v53, %v702_v51 }
 0x132   :  { %v1254_v60 = vpack.c.bf16 %v669_v56, %v668_v54  ;;  %v1334_v61 = vpack.c.bf16 %v701_v57, %v700_v55  ;;  %v1492_v62 = vpop.f32.mrb[12].mxu0  ;;  %v1524_v63 = vpop.f32.mrb[12].mxu1 }
 0x133   :  { %1395 = vst [vmem:[#allocation7 + $0x28] sm:$0xff] %v1259_v58   ;;  %1411 = vst [vmem:[#allocation7 + $0xa8] sm:$0xff] %v1339_v59   ;;  %v462_v0 = vadd.f32 %v1492_v62, %v1733_v40  ;;  %v590_v1 = vadd.f32 %v1524_v63, %v1733_v40  ;;  %v453_v2 = vpop.f32.mrb[13].mxu0  ;;  %v581_v3 = vpop.f32.mrb[13].mxu1 }
 0x134   :  { %1394 = vst [vmem:[#allocation7 + $0x20] sm:$0xff] %v1254_v60   ;;  %1410 = vst [vmem:[#allocation7 + $0xa0] sm:$0xff] %v1334_v61   ;;  %v454_v4 = vadd.f32 %v1733_v40, %v453_v2  ;;  %v582_v5 = vadd.f32 %v1733_v40, %v581_v3  ;;  %v1493_v6 = vpop.f32.mrb[14].mxu0  ;;  %v1525_v7 = vpop.f32.mrb[14].mxu1 }
 0x135   :  { %v465_v8 = vadd.f32 %v1493_v6, %v1733_v40  ;;  %v593_v9 = vadd.f32 %v1525_v7, %v1733_v40  ;;  %v456_v10 = vpop.f32.mrb[15].mxu0  ;;  %v584_v11 = vpop.f32.mrb[15].mxu1  ;;  %v674_v14 = vmax.f32 %v462_v0, 0.0  ;;  %v706_v15 = vmax.f32 %v590_v1, 0.0 }
 0x136   :  { %v457_v12 = vadd.f32 %v1733_v40, %v456_v10  ;;  %v585_v13 = vadd.f32 %v1733_v40, %v584_v11  ;;  %v672_v18 = vmax.f32 %v454_v4, 0.0  ;;  %v704_v19 = vmax.f32 %v582_v5, 0.0 }
 0x137   :  { %v675_v16 = vmax.f32 %v465_v8, 0.0  ;;  %v707_v17 = vmax.f32 %v593_v9, 0.0 }
 0x138   :  { %v673_v20 = vmax.f32 %v457_v12, 0.0  ;;  %v705_v21 = vmax.f32 %v585_v13, 0.0 }
 0x139   :  { %v1269_v22 = vpack.c.bf16 %v675_v16, %v674_v14  ;;  %v1349_v23 = vpack.c.bf16 %v707_v17, %v706_v15 }
 0x13a   :  { %v1264_v24 = vpack.c.bf16 %v673_v20, %v672_v18  ;;  %v1344_v25 = vpack.c.bf16 %v705_v21, %v704_v19  ;;  %v1496_v26 = vpop.f32.mrb[16].mxu0  ;;  %v1528_v27 = vpop.f32.mrb[16].mxu1 }
 0x13b   :  { %1397 = vst [vmem:[#allocation7 + $0x38] sm:$0xff] %v1269_v22   ;;  %1413 = vst [vmem:[#allocation7 + $0xb8] sm:$0xff] %v1349_v23   ;;  %v478_v28 = vadd.f32 %v1496_v26, %v1733_v40  ;;  %v606_v29 = vadd.f32 %v1528_v27, %v1733_v40  ;;  %v469_v30 = vpop.f32.mrb[17].mxu0  ;;  %v597_v31 = vpop.f32.mrb[17].mxu1 }
 0x13c   :  { %1396 = vst [vmem:[#allocation7 + $0x30] sm:$0xff] %v1264_v24   ;;  %1412 = vst [vmem:[#allocation7 + $0xb0] sm:$0xff] %v1344_v25   ;;  %v470_v32 = vadd.f32 %v1733_v40, %v469_v30  ;;  %v598_v33 = vadd.f32 %v1733_v40, %v597_v31  ;;  %v1497_v34 = vpop.f32.mrb[18].mxu0  ;;  %v1529_v35 = vpop.f32.mrb[18].mxu1 }
 0x13d   :  { %v481_v36 = vadd.f32 %v1497_v34, %v1733_v40  ;;  %v609_v37 = vadd.f32 %v1529_v35, %v1733_v40  ;;  %v472_v38 = vpop.f32.mrb[19].mxu0  ;;  %v600_v39 = vpop.f32.mrb[19].mxu1  ;;  %v678_v43 = vmax.f32 %v478_v28, 0.0  ;;  %v710_v44 = vmax.f32 %v606_v29, 0.0 }
 0x13e   :  { %v473_v41 = vadd.f32 %v1733_v40, %v472_v38  ;;  %v601_v42 = vadd.f32 %v1733_v40, %v600_v39  ;;  %v676_v47 = vmax.f32 %v470_v32, 0.0  ;;  %v708_v48 = vmax.f32 %v598_v33, 0.0 }
 0x13f   :  { %v679_v45 = vmax.f32 %v481_v36, 0.0  ;;  %v711_v46 = vmax.f32 %v609_v37, 0.0 }
 0x140   :  { %v677_v49 = vmax.f32 %v473_v41, 0.0  ;;  %v709_v50 = vmax.f32 %v601_v42, 0.0 }
 0x141   :  { %v1279_v51 = vpack.c.bf16 %v679_v45, %v678_v43  ;;  %v1359_v52 = vpack.c.bf16 %v711_v46, %v710_v44 }
 0x142   :  { %v1274_v53 = vpack.c.bf16 %v677_v49, %v676_v47  ;;  %v1354_v54 = vpack.c.bf16 %v709_v50, %v708_v48  ;;  %v1500_v55 = vpop.f32.mrb[20].mxu0  ;;  %v1532_v56 = vpop.f32.mrb[20].mxu1 }
 0x143   :  { %1399 = vst [vmem:[#allocation7 + $0x48] sm:$0xff] %v1279_v51   ;;  %1415 = vst [vmem:[#allocation7 + $0xc8] sm:$0xff] %v1359_v52   ;;  %v494_v57 = vadd.f32 %v1500_v55, %v1733_v40  ;;  %v622_v58 = vadd.f32 %v1532_v56, %v1733_v40  ;;  %v485_v59 = vpop.f32.mrb[21].mxu0  ;;  %v613_v60 = vpop.f32.mrb[21].mxu1 }
 0x144   :  { %1398 = vst [vmem:[#allocation7 + $0x40] sm:$0xff] %v1274_v53   ;;  %1414 = vst [vmem:[#allocation7 + $0xc0] sm:$0xff] %v1354_v54   ;;  %v486_v61 = vadd.f32 %v1733_v40, %v485_v59  ;;  %v614_v62 = vadd.f32 %v1733_v40, %v613_v60  ;;  %v1501_v63 = vpop.f32.mrb[22].mxu0  ;;  %v1533_v0 = vpop.f32.mrb[22].mxu1 }
 0x145   :  { %v497_v1 = vadd.f32 %v1501_v63, %v1733_v40  ;;  %v625_v2 = vadd.f32 %v1533_v0, %v1733_v40  ;;  %v488_v3 = vpop.f32.mrb[23].mxu0  ;;  %v616_v4 = vpop.f32.mrb[23].mxu1  ;;  %v682_v7 = vmax.f32 %v494_v57, 0.0  ;;  %v714_v8 = vmax.f32 %v622_v58, 0.0 }
 0x146   :  { %v489_v5 = vadd.f32 %v1733_v40, %v488_v3  ;;  %v617_v6 = vadd.f32 %v1733_v40, %v616_v4  ;;  %v680_v11 = vmax.f32 %v486_v61, 0.0  ;;  %v712_v12 = vmax.f32 %v614_v62, 0.0 }
 0x147   :  { %v683_v9 = vmax.f32 %v497_v1, 0.0  ;;  %v715_v10 = vmax.f32 %v625_v2, 0.0 }
 0x148   :  { %v681_v13 = vmax.f32 %v489_v5, 0.0  ;;  %v713_v14 = vmax.f32 %v617_v6, 0.0 }
 0x149   :  { %v1289_v15 = vpack.c.bf16 %v683_v9, %v682_v7  ;;  %v1369_v16 = vpack.c.bf16 %v715_v10, %v714_v8 }
 0x14a   :  { %v1284_v17 = vpack.c.bf16 %v681_v13, %v680_v11  ;;  %v1364_v18 = vpack.c.bf16 %v713_v14, %v712_v12  ;;  %v1504_v19 = vpop.f32.mrb[24].mxu0  ;;  %v1536_v20 = vpop.f32.mrb[24].mxu1 }
 0x14b   :  { %1401 = vst [vmem:[#allocation7 + $0x58] sm:$0xff] %v1289_v15   ;;  %1417 = vst [vmem:[#allocation7 + $0xd8] sm:$0xff] %v1369_v16   ;;  %v510_v21 = vadd.f32 %v1504_v19, %v1733_v40  ;;  %v638_v22 = vadd.f32 %v1536_v20, %v1733_v40  ;;  %v501_v23 = vpop.f32.mrb[25].mxu0  ;;  %v629_v24 = vpop.f32.mrb[25].mxu1 }
 0x14c   :  { %1400 = vst [vmem:[#allocation7 + $0x50] sm:$0xff] %v1284_v17   ;;  %1416 = vst [vmem:[#allocation7 + $0xd0] sm:$0xff] %v1364_v18   ;;  %v502_v25 = vadd.f32 %v1733_v40, %v501_v23  ;;  %v630_v26 = vadd.f32 %v1733_v40, %v629_v24  ;;  %v1505_v27 = vpop.f32.mrb[26].mxu0  ;;  %v1537_v28 = vpop.f32.mrb[26].mxu1 }
 0x14d   :  { %v513_v29 = vadd.f32 %v1505_v27, %v1733_v40  ;;  %v641_v30 = vadd.f32 %v1537_v28, %v1733_v40  ;;  %v504_v31 = vpop.f32.mrb[27].mxu0  ;;  %v632_v32 = vpop.f32.mrb[27].mxu1  ;;  %v686_v35 = vmax.f32 %v510_v21, 0.0  ;;  %v718_v36 = vmax.f32 %v638_v22, 0.0 }
 0x14e   :  { %v505_v33 = vadd.f32 %v1733_v40, %v504_v31  ;;  %v633_v34 = vadd.f32 %v1733_v40, %v632_v32  ;;  %v684_v39 = vmax.f32 %v502_v25, 0.0  ;;  %v716_v41 = vmax.f32 %v630_v26, 0.0 }
 0x14f   :  { %v687_v37 = vmax.f32 %v513_v29, 0.0  ;;  %v719_v38 = vmax.f32 %v641_v30, 0.0 }
 0x150   :  { %v685_v42 = vmax.f32 %v505_v33, 0.0  ;;  %v717_v43 = vmax.f32 %v633_v34, 0.0 }
 0x151   :  { %v1299_v44 = vpack.c.bf16 %v687_v37, %v686_v35  ;;  %v1379_v45 = vpack.c.bf16 %v719_v38, %v718_v36 }
 0x152   :  { %v1294_v46 = vpack.c.bf16 %v685_v42, %v684_v39  ;;  %v1374_v47 = vpack.c.bf16 %v717_v43, %v716_v41  ;;  %v1508_v48 = vpop.f32.mrb[28].mxu0  ;;  %v1540_v49 = vpop.f32.mrb[28].mxu1 }
 0x153   :  { %1403 = vst [vmem:[#allocation7 + $0x68] sm:$0xff] %v1299_v44   ;;  %1419 = vst [vmem:[#allocation7 + $0xe8] sm:$0xff] %v1379_v45   ;;  %v526_v50 = vadd.f32 %v1508_v48, %v1733_v40  ;;  %v654_v51 = vadd.f32 %v1540_v49, %v1733_v40  ;;  %v517_v52 = vpop.f32.mrb[29].mxu0  ;;  %v645_v53 = vpop.f32.mrb[29].mxu1 }
 0x154   :  { %1402 = vst [vmem:[#allocation7 + $0x60] sm:$0xff] %v1294_v46   ;;  %1418 = vst [vmem:[#allocation7 + $0xe0] sm:$0xff] %v1374_v47   ;;  %v518_v54 = vadd.f32 %v1733_v40, %v517_v52  ;;  %v646_v55 = vadd.f32 %v1733_v40, %v645_v53  ;;  %v1509_v56 = vpop.f32.mrb[30].mxu0  ;;  %v1541_v57 = vpop.f32.mrb[30].mxu1 }
 0x155   :  { %v529_v58 = vadd.f32 %v1509_v56, %v1733_v40  ;;  %v657_v59 = vadd.f32 %v1541_v57, %v1733_v40  ;;  %v520_v60 = vpop.f32.mrb[31].mxu0  ;;  %v648_v61 = vpop.f32.mrb[31].mxu1  ;;  %v690_v0 = vmax.f32 %v526_v50, 0.0  ;;  %v722_v1 = vmax.f32 %v654_v51, 0.0 }
 0x156   :  { %v521_v62 = vadd.f32 %v1733_v40, %v520_v60  ;;  %v649_v63 = vadd.f32 %v1733_v40, %v648_v61  ;;  %v688_v4 = vmax.f32 %v518_v54, 0.0  ;;  %v720_v5 = vmax.f32 %v646_v55, 0.0 }
 0x157   :  { %v691_v2 = vmax.f32 %v529_v58, 0.0  ;;  %v723_v3 = vmax.f32 %v657_v59, 0.0 }
 0x158   :  { %v689_v6 = vmax.f32 %v521_v62, 0.0  ;;  %v721_v7 = vmax.f32 %v649_v63, 0.0 }
 0x159   :  { %v1309_v8 = vpack.c.bf16 %v691_v2, %v690_v0  ;;  %v1389_v9 = vpack.c.bf16 %v723_v3, %v722_v1 }
 0x15a   :  { %v1304_v10 = vpack.c.bf16 %v689_v6, %v688_v4  ;;  %v1384_v11 = vpack.c.bf16 %v721_v7, %v720_v5 }
 0x15b   :  { %1405 = vst [vmem:[#allocation7 + $0x78] sm:$0xff] %v1309_v8   ;;  %1421 = vst [vmem:[#allocation7 + $0xf8] sm:$0xff] %v1389_v9  }
 0x15c   :  { %1404 = vst [vmem:[#allocation7 + $0x70] sm:$0xff] %v1304_v10   ;;  %1420 = vst [vmem:[#allocation7 + $0xf0] sm:$0xff] %v1384_v11  }
 0x15d   :  { %1658 = shalt.err (!%p1655_p6)
}
 0x15e   :  { %s1659_s15 = scalar_lea.hbm %s1817_s3, 4096 }
 0x15f   :  { %p1660_p7 = scmp.ne.s32.totalorder %s1817_s3, %s1659_s15  ;;  %p1663_p8 = scmp.lt.u32.totalorder %s1659_s15, %s1817_s3 }
 0x161   :  { %p1665_p9 = pnand %p1663_p8, %p1660_p7 }
 0x163   :  { %1668 = shalt.err (!%p1665_p9)
}
 0x164   :  { %1055 = dma.vmem_to_hbm [thread:$0]  %s1050_s11, 4096, %s1817_s3, [#allocation4], %s1676_s22, %s1676_s22, %s1677_s23  }
 0x165   :  { %1673 = dma.done.wait [#allocation4], 4096  }
 0x166   :  { %1674 = vsyncadd [#allocation4], 4294963200 }
 0x167   :  { %1059 = vsyncpa [#allocation3], 1 }
 0x168   :  { %1060 = vsyncpa [#allocation6], 1 }
 0x169   :  { %1061 = vsyncpa [#allocation4], 1 }

</bundles_post_ra>
